<compile_context>
chip_gen: v6e
topology: v6e:2x2x1
jax: 0.10.0
libtpu: 0.0.40
codegen_flags: <defaults>
</compile_context>

<pallas_src>
import functools

import jax
import jax.numpy as jnp
from jax.experimental import pallas as pl
from jax.experimental.pallas import tpu as pltpu

_VMEM_LIMIT = 32 * 1024 * 1024  # explicit scoped-VMEM limit (safe on v5e/v6e/v7x)


def _pick_tile(n, cap):
    """Largest usable tile <= cap: full dim if small, else a 128-multiple divisor."""
    if n <= cap:
        return n
    t = (cap // 128) * 128
    while t >= 128:
        if n % t == 0:
            return t
        t -= 128
    raise ValueError(f"n={n} must be a multiple of 128 to tile (or <= {cap}).")


def _proj_kernel(h_ref, w_ref, out_ref):
    # out = h @ [W | W·a_l | W·a_r]   (bf16 operands, f32 accumulation on the MXU)
    out_ref[...] = jnp.dot(h_ref[...].astype(jnp.bfloat16), w_ref[...],
                           preferred_element_type=jnp.float32)


def _gat_attn_kernel(adj_ref, er_ref, elt_ref, feat_ref, bias_ref, out_ref,
                     m_ref, l_ref, acc_ref, *,
                     num_heads, negative_slope, apply_relu, mean_heads):
    j = pl.program_id(1)

    @pl.when(j == 0)
    def _init():
        m_ref[...] = jnp.full_like(m_ref, -1e30)
        l_ref[...] = jnp.zeros_like(l_ref)
        acc_ref[...] = jnp.zeros_like(acc_ref)

    # Single mask (no redundant -inf fill + post-exp multiply): the unmasked row-max
    # is a valid softmax stabilizer; masking is applied once, multiplicatively, on p.
    maskf = (adj_ref[...] != 0).astype(jnp.float32)              # [tv, tu]

    for hd in range(num_heads):                                  # static unroll (H small)
        er_col = er_ref[:, hd:hd + 1]                            # [tv, 1]  dest term
        el_row = elt_ref[hd:hd + 1, :]                           # [1, tu]  source term
        e = er_col + el_row                                      # [tv, tu]
        e = jnp.where(e > 0, e, negative_slope * e)              # leaky_relu

        # Online (flash-style) softmax accumulation over source tiles.
        m_prev = m_ref[hd]                                       # [tv, 1]
        m_new = jnp.maximum(m_prev, jnp.max(e, axis=1, keepdims=True))
        scale = jnp.exp(m_prev - m_new)                          # [tv, 1]
        p = jnp.exp(e - m_new) * maskf                           # [tv, tu]

        l_ref[hd] = scale * l_ref[hd] + jnp.sum(p, axis=1, keepdims=True)
        acc_ref[hd] = scale * acc_ref[hd] + jnp.dot(
            p.astype(jnp.bfloat16), feat_ref[hd],                # [tu, Fout] bf16
            preferred_element_type=jnp.float32)                  # [tv, Fout] f32
        m_ref[hd] = m_new

    @pl.when(j == pl.num_programs(1) - 1)
    def _finalize():
        outs = []
        for hd in range(num_heads):
            # Guard against isolated destination nodes (zero incoming edges).
            inv_l = pl.reciprocal(jnp.maximum(l_ref[hd], 1e-20), approx=True)
            o = acc_ref[hd] * inv_l + bias_ref[hd:hd + 1, :]     # [tv, Fout]
            if apply_relu:
                o = jnp.maximum(o, 0.0)
            outs.append(o)
        if mean_heads:
            out_ref[...] = sum(outs) * (1.0 / num_heads)         # .mean(1) over heads
        else:
            out_ref[...] = jnp.concatenate(outs, axis=1)         # one lane-dense store


def gat_conv(h, w, attn_l, attn_r, bias, adj_i8, *, num_heads, out_feats,
             negative_slope=0.2, apply_relu=True, mean_heads=False):
    n, fin = h.shape
    hf = num_heads * out_feats
    d = hf + 2 * num_heads

    # Fold the attention vectors into the projection weights (wrapper-side, tiny).
    w3 = w.reshape(fin, num_heads, out_feats)
    wal = jnp.einsum('fhk,hk->fh', w3, attn_l)                   # [Fin, H]
    war = jnp.einsum('fhk,hk->fh', w3, attn_r)                   # [Fin, H]
    w_cat = jnp.concatenate([w, wal, war], axis=1).astype(jnp.bfloat16)

    # 1) Projection: feat / el / er from one matmul, tiled over node rows.
    tm = _pick_tile(n, 256)
    feat_all = pl.pallas_call(
        _proj_kernel,
        out_shape=jax.ShapeDtypeStruct((n, d), jnp.float32),
        grid_spec=pltpu.PrefetchScalarGridSpec(
            num_scalar_prefetch=0,
            grid=(n // tm,),
            in_specs=[pl.BlockSpec((tm, fin), lambda i: (i, 0)),
                      pl.BlockSpec((fin, d), lambda i: (0, 0))],
            out_specs=pl.BlockSpec((tm, d), lambda i: (i, 0))),
        compiler_params=pltpu.CompilerParams(
            dimension_semantics=("parallel",),
            vmem_limit_bytes=_VMEM_LIMIT),
    )(h, w_cat)

    # Layout plumbing (wrapper-side, no compute): head-major features, transposed el.
    feat_h = jnp.transpose(
        feat_all[:, :hf].reshape(n, num_heads, out_feats),
        (1, 0, 2)).astype(jnp.bfloat16)                          # [H, N, Fout]
    el_t = jnp.transpose(feat_all[:, hf:hf + num_heads])         # [H, N]  (source term)
    er = feat_all[:, hf + num_heads:]                            # [N, H]  (dest term)

    # 2) Attention + aggregation, tiled over (dest tile, source tile).
    tv = _pick_tile(n, 128)
    tu = _pick_tile(n, 128)
    out_dim = out_feats if mean_heads else hf

    kernel = functools.partial(
        _gat_attn_kernel, num_heads=num_heads,
        negative_slope=negative_slope, apply_relu=apply_relu,
        mean_heads=mean_heads)

    return pl.pallas_call(
        kernel,
        out_shape=jax.ShapeDtypeStruct((n, out_dim), jnp.float32),
        grid_spec=pltpu.PrefetchScalarGridSpec(
            num_scalar_prefetch=0,
            grid=(n // tv, n // tu),
            in_specs=[
                pl.BlockSpec((tv, tu), lambda i, j: (i, j)),                      # adj i8
                pl.BlockSpec((tv, num_heads), lambda i, j: (i, 0)),               # er
                pl.BlockSpec((num_heads, tu), lambda i, j: (0, j)),               # el^T
                pl.BlockSpec((num_heads, tu, out_feats), lambda i, j: (0, j, 0)),  # feat
                pl.BlockSpec((num_heads, out_feats), lambda i, j: (0, 0)),        # bias
            ],
            out_specs=pl.BlockSpec((tv, out_dim), lambda i, j: (i, 0)),
            scratch_shapes=[
                pltpu.VMEM((num_heads, tv, 1), jnp.float32),          # running max m
                pltpu.VMEM((num_heads, tv, 1), jnp.float32),          # running denom l
                pltpu.VMEM((num_heads, tv, out_feats), jnp.float32),  # acc
            ]),
        compiler_params=pltpu.CompilerParams(
            dimension_semantics=("parallel", "arbitrary"),
            vmem_limit_bytes=_VMEM_LIMIT),
    )(adj_i8, er, el_t, feat_h, bias)


def init_gat_params(key, in_feats, n_hidden, n_classes, n_layers, num_heads):
    """Deterministic synthetic init matching DGL GATConv parameter shapes."""
    dims = ([(in_feats, n_hidden)]
            + [(n_hidden * num_heads, n_hidden)] * (n_layers - 1)
            + [(n_hidden * num_heads, n_classes)])
    params = []
    for fin, fout in dims:
        key, k1, k2, k3 = jax.random.split(key, 4)
        scale = (2.0 / (fin + fout * num_heads)) ** 0.5
        w = jax.random.normal(k1, (fin, num_heads * fout), jnp.float32) * scale
        al = jax.random.normal(k2, (num_heads, fout), jnp.float32) * 0.1
        ar = jax.random.normal(k3, (num_heads, fout), jnp.float32) * 0.1
        b = jnp.zeros((num_heads, fout), jnp.float32)   # DGL inits bias to zeros
        params.append((w, al, ar, b, fout))
    return params


def gat_forward(params, adj, x, num_heads, negative_slope=0.2):
    adj_i8 = (adj != 0).astype(jnp.int8)   # int8 mask: 4x less HBM/VMEM than f32
    h = x
    for (w, al, ar, b, fout) in params[:-1]:
        h = gat_conv(h, w, al, ar, b, adj_i8, num_heads=num_heads, out_feats=fout,
                     negative_slope=negative_slope, apply_relu=True,
                     mean_heads=False)                 # head concat == flatten(1)
    w, al, ar, b, fout = params[-1]
    logits = gat_conv(h, w, al, ar, b, adj_i8, num_heads=num_heads, out_feats=fout,
                      negative_slope=negative_slope, apply_relu=False,
                      mean_heads=True)                 # .mean(1), no activation
    return logits


if __name__ == "__main__":
    N, in_feats, n_hidden, n_classes = 256, 16, 8, 4
    n_layers, num_heads = 2, 3

    key = jax.random.PRNGKey(0)
    k_x, k_adj, k_p = jax.random.split(key, 3)

    x = jax.random.normal(k_x, (N, in_feats), jnp.float32)
    # Random sparse-ish graph + self-loops (every node has >= 1 incoming edge).
    rand_edges = (jax.random.uniform(k_adj, (N, N)) < 0.1).astype(jnp.float32)
    adj = jnp.maximum(rand_edges, jnp.eye(N, dtype=jnp.float32))

    params = init_gat_params(k_p, in_feats, n_hidden, n_classes,
                             n_layers, num_heads)

    logits = gat_forward(params, adj, x, num_heads)
    logits = jax.block_until_ready(logits)
    assert logits.shape == (N, n_classes)
    print("KERNEL_OK")
</pallas_src>

<mosaic_0001>
module attributes {stable_mosaic.version = 11 : i64} {
  func.func @_proj_kernel(%arg0: i32, %arg1: memref<256x16xf32, #tpu.memory_space<vmem>>, %arg2: memref<16x30xbf16, #tpu.memory_space<vmem>>, %arg3: memref<256x30xf32, #tpu.memory_space<vmem>>) attributes {dimension_semantics = [#tpu.dimension_semantics<parallel>], iteration_bounds = array<i64: 1>, scalar_prefetch = 0 : i64, scratch_operands = 0 : i64, tpu.core_type = #tpu.core_type<tc>, window_params = [{transform_indices = @transform_0, window_bounds = array<i64: 256, 16>}, {pipeline_mode = #tpu.pipeline_mode<synchronous>, transform_indices = @transform_1, window_bounds = array<i64: 16, 30>}, {transform_indices = @transform_2, window_bounds = array<i64: 256, 30>}]} {
    %c0 = arith.constant 0 : index
    %c0_0 = arith.constant 0 : index
    %0 = vector.load %arg1[%c0, %c0_0] : memref<256x16xf32, #tpu.memory_space<vmem>>, vector<256x16xf32>
    %1 = arith.truncf %0 : vector<256x16xf32> to vector<256x16xbf16>
    %c0_1 = arith.constant 0 : index
    %c0_2 = arith.constant 0 : index
    %2 = vector.load %arg2[%c0_1, %c0_2] : memref<16x30xbf16, #tpu.memory_space<vmem>>, vector<16x30xbf16>
    %cst = arith.constant dense<0.000000e+00> : vector<256x30xf32>
    %3 = tpu.matmul %1, %2, %cst {dimension_numbers = #tpu.dot_dimension_numbers<[1], [0], [0], [1], [0, 0, 1, 1], [], []>} : vector<256x16xbf16>, vector<16x30xbf16>, vector<256x30xf32> -> vector<256x30xf32>
    %c0_3 = arith.constant 0 : index
    %c0_4 = arith.constant 0 : index
    %4 = vector.load %arg3[%c0_3, %c0_4] : memref<256x30xf32, #tpu.memory_space<vmem>>, vector<256x30xf32>
    tpu.vector_store %arg3[%c0_3, %c0_4], %3 {strides = array<i32>} : memref<256x30xf32, #tpu.memory_space<vmem>>, vector<256x30xf32>,
    return
  }
  func.func @transform_0(%arg0: i32) -> (i32, i32) {
    %c0_i32 = arith.constant 0 : i32
    %c0_i32_0 = arith.constant 0 : i32
    return %arg0, %c0_i32 : i32, i32
  }
  func.func @transform_1(%arg0: i32) -> (i32, i32) {
    %c0_i32 = arith.constant 0 : i32
    %c0_i32_0 = arith.constant 0 : i32
    %c0_i32_1 = arith.constant 0 : i32
    return %c0_i32, %c0_i32_0 : i32, i32
  }
  func.func @transform_2(%arg0: i32) -> (i32, i32) {
    %c0_i32 = arith.constant 0 : i32
    %c0_i32_0 = arith.constant 0 : i32
    return %arg0, %c0_i32 : i32, i32
  }
}

</mosaic_0001>

<bundles_post_ra>
// kernel: tpu_custom_call.1
= control target key start
LH: loop header
LB: loop body
LE: loop exit
PB: predicated region body
PF: predicated region fallthrough
CT: control target
= control target key end

     0   :  { %vm68_vm0 = vcmask 130048   ;;  %vm278_vm1 = vcmask 244736   ;;  %s644_s1 = inlined_call_operand.vmem [shape: bf16[16,30], index: 1, kind: input, shape index: {}]   ;;  %s645_s0 = inlined_call_operand.vmem [shape: f32[256,16], index: 0, kind: input, shape index: {}]   ;;  %s646_s2 = inlined_call_operand.vmem [shape: f32[256,30], index: 2, kind: output, shape index: {}]  }
   0x1   :  { %v385_v0 = vld [vmem:[%s644_s1] sm:$0xff]   ;;  %v13_v2 = vld [vmem:[%s645_s0 + $0x8] sm:$0xff]  ;;  %v14_v6 = vld [vmem:[%s645_s0 + $0x10] sm:$0xff] }
   0x2   :  { %v12_v1 = vld [vmem:[%s645_s0] sm:$0xff]  ;;  %349 = vmatprep.subr.bf16.mxu0 %v385_v0  ;;  %383 = vmatprep.subr.bf16.mxu1 %v385_v0  ;;  %v29_v5 = vld [vmem:[%s645_s0 + $0x88] sm:$0xff]  ;;  %v15_v7 = vld [vmem:[%s645_s0 + $0x18] sm:$0xff] }
   0x3   :  { %v28_v3 = vld [vmem:[%s645_s0 + $0x80] sm:$0xff]  ;;  %v44_v4 = vpack.c.bf16 %v13_v2, %v12_v1  ;;  %350 = vmatpush3.bf16.msra.mxu0 %v385_v0  ;;  %384 = vmatpush3.bf16.msra.mxu1 %v385_v0  ;;  %v45_v9 = vpack.c.bf16 %v15_v7, %v14_v6  ;;  %v30_v10 = vld [vmem:[%s645_s0 + $0x90] sm:$0xff]  ;;  %v31_v11 = vld [vmem:[%s645_s0 + $0x98] sm:$0xff] }
   0x4   :  { %v52_v8 = vpack.c.bf16 %v29_v5, %v28_v3  ;;  %v16_v12 = vld [vmem:[%s645_s0 + $0x20] sm:$0xff]  ;;  %v53_v13 = vpack.c.bf16 %v31_v11, %v30_v10  ;;  %v17_v14 = vld [vmem:[%s645_s0 + $0x28] sm:$0xff]  ;;  %v18_v19 = vld [vmem:[%s645_s0 + $0x30] sm:$0xff] }
   0x5   :  { %351 = vmatprep.mubr.msk.bf16.mxu0 %vm68_vm0, %v44_v4  ;;  %v32_v15 = vld [vmem:[%s645_s0 + $0xa0] sm:$0xff]  ;;  %v33_v16 = vld [vmem:[%s645_s0 + $0xa8] sm:$0xff]  ;;  %v46_v17 = vpack.c.bf16 %v17_v14, %v16_v12  ;;  %v19_v20 = vld [vmem:[%s645_s0 + $0x38] sm:$0xff] }
   0x6   :  { %367 = vmatprep.mubr.msk.bf16.mxu1 %vm68_vm0, %v52_v8  ;;  %v54_v18 = vpack.c.bf16 %v33_v16, %v32_v15  ;;  %352 = vmatmul.mubr.msk.bf16.vlgmr.msra.gmra.mxu0 %vm68_vm0, %v45_v9  ;;  %v34_v21 = vld [vmem:[%s645_s0 + $0xb0] sm:$0xff]  ;;  %v35_v22 = vld [vmem:[%s645_s0 + $0xb8] sm:$0xff]  ;;  %v20_v23 = vld [vmem:[%s645_s0 + $0x40] sm:$0xff]  ;;  %v47_v27 = vpack.c.bf16 %v19_v20, %v18_v19 }
   0x7   :  { %368 = vmatmul.mubr.msk.bf16.vlgmr.msra.gmra.mxu1 %vm68_vm0, %v53_v13  ;;  %355 = vmatprep.mubr.msk.bf16.mxu0 %vm68_vm0, %v46_v17  ;;  %v21_v24 = vld [vmem:[%s645_s0 + $0x48] sm:$0xff]  ;;  %v36_v25 = vld [vmem:[%s645_s0 + $0xc0] sm:$0xff]  ;;  %v55_v28 = vpack.c.bf16 %v35_v22, %v34_v21  ;;  %v22_v31 = vld [vmem:[%s645_s0 + $0x50] sm:$0xff] }
   0x8   :  { %371 = vmatprep.mubr.msk.bf16.mxu1 %vm68_vm0, %v54_v18  ;;  %v37_v26 = vld [vmem:[%s645_s0 + $0xc8] sm:$0xff]  ;;  %v48_v29 = vpack.c.bf16 %v21_v24, %v20_v23  ;;  %v23_v32 = vld [vmem:[%s645_s0 + $0x58] sm:$0xff]  ;;  %v38_v33 = vld [vmem:[%s645_s0 + $0xd0] sm:$0xff] }
   0x9   :  { %v56_v30 = vpack.c.bf16 %v37_v26, %v36_v25  ;;  %v39_v34 = vld [vmem:[%s645_s0 + $0xd8] sm:$0xff]  ;;  %v24_v35 = vld [vmem:[%s645_s0 + $0x60] sm:$0xff]  ;;  %v25_v36 = vld [vmem:[%s645_s0 + $0x68] sm:$0xff]  ;;  %v49_v39 = vpack.c.bf16 %v23_v32, %v22_v31 }
   0xa   :  { %v40_v37 = vld [vmem:[%s645_s0 + $0xe0] sm:$0xff]  ;;  %v41_v38 = vld [vmem:[%s645_s0 + $0xe8] sm:$0xff]  ;;  %v57_v40 = vpack.c.bf16 %v39_v34, %v38_v33  ;;  %v50_v41 = vpack.c.bf16 %v25_v36, %v24_v35  ;;  %v26_v43 = vld [vmem:[%s645_s0 + $0x70] sm:$0xff] }
   0xb   :  { %v58_v42 = vpack.c.bf16 %v41_v38, %v40_v37  ;;  %v27_v44 = vld [vmem:[%s645_s0 + $0x78] sm:$0xff]  ;;  %v42_v45 = vld [vmem:[%s645_s0 + $0xf0] sm:$0xff] }
   0xc   :  { %v43_v46 = vld [vmem:[%s645_s0 + $0xf8] sm:$0xff]  ;;  %v51_v47 = vpack.c.bf16 %v27_v44, %v26_v43 }
   0xd   :  { %v59_v48 = vpack.c.bf16 %v43_v46, %v42_v45 }
   0xe   :  { %356 = vmatmul.mubr.msk.bf16.gmra.mxu0 %vm68_vm0, %v47_v27 }
   0xf   :  { %372 = vmatmul.mubr.msk.bf16.gmra.mxu1 %vm68_vm0, %v55_v28  ;;  %359 = vmatprep.mubr.msk.bf16.mxu0 %vm68_vm0, %v48_v29 }
  0x10   :  { %375 = vmatprep.mubr.msk.bf16.mxu1 %vm68_vm0, %v56_v30 }
  0x16   :  { %360 = vmatmul.mubr.msk.bf16.gmra.mxu0 %vm68_vm0, %v49_v39 }
  0x17   :  { %376 = vmatmul.mubr.msk.bf16.gmra.mxu1 %vm68_vm0, %v57_v40  ;;  %363 = vmatprep.mubr.msk.bf16.mxu0 %vm68_vm0, %v50_v41 }
  0x18   :  { %379 = vmatprep.mubr.msk.bf16.mxu1 %vm68_vm0, %v58_v42 }
  0x1e   :  { %364 = vmatmul.mubr.msk.bf16.gmra.mxu0 %vm68_vm0, %v51_v47 }
  0x1f   :  { %380 = vmatmul.mubr.msk.bf16.gmra.mxu1 %vm68_vm0, %v59_v48 }
  0xc6   :  { %v353_v49 = vpop.f32.mrf.mxu0 }
  0xc7   :  { %v369_v50 = vpop.f32.mrf.mxu1  ;;  %281 = vst.msk [vmem:[%s646_s2 + $0x10] sm:$0xff] %vm278_vm1, %v353_v49 }
  0xc8   :  { %297 = vst.msk [vmem:[%s646_s2 + $0x90] sm:$0xff] %vm278_vm1, %v369_v50  ;;  %v151_v51 = vpop.f32.mrf.mxu0 }
  0xc9   :  { %v215_v52 = vpop.f32.mrf.mxu1  ;;  %279 = vst.msk [vmem:[%s646_s2] sm:$0xff] %vm278_vm1, %v151_v51 }
  0xca   :  { %295 = vst.msk [vmem:[%s646_s2 + $0x80] sm:$0xff] %vm278_vm1, %v215_v52  ;;  %v354_v53 = vpop.f32.mrf.mxu0 }
  0xcb   :  { %v370_v54 = vpop.f32.mrf.mxu1  ;;  %282 = vst.msk [vmem:[%s646_s2 + $0x18] sm:$0xff] %vm278_vm1, %v354_v53 }
  0xcc   :  { %298 = vst.msk [vmem:[%s646_s2 + $0x98] sm:$0xff] %vm278_vm1, %v370_v54  ;;  %v154_v55 = vpop.f32.mrf.mxu0 }
  0xcd   :  { %v218_v56 = vpop.f32.mrf.mxu1  ;;  %280 = vst.msk [vmem:[%s646_s2 + $0x8] sm:$0xff] %vm278_vm1, %v154_v55 }
  0xce   :  { %296 = vst.msk [vmem:[%s646_s2 + $0x88] sm:$0xff] %vm278_vm1, %v218_v56  ;;  %v357_v57 = vpop.f32.mrf.mxu0 }
  0xcf   :  { %v373_v58 = vpop.f32.mrf.mxu1  ;;  %285 = vst.msk [vmem:[%s646_s2 + $0x30] sm:$0xff] %vm278_vm1, %v357_v57 }
  0xd0   :  { %301 = vst.msk [vmem:[%s646_s2 + $0xb0] sm:$0xff] %vm278_vm1, %v373_v58  ;;  %v167_v59 = vpop.f32.mrf.mxu0 }
  0xd1   :  { %v231_v60 = vpop.f32.mrf.mxu1  ;;  %283 = vst.msk [vmem:[%s646_s2 + $0x20] sm:$0xff] %vm278_vm1, %v167_v59 }
  0xd2   :  { %299 = vst.msk [vmem:[%s646_s2 + $0xa0] sm:$0xff] %vm278_vm1, %v231_v60  ;;  %v358_v61 = vpop.f32.mrf.mxu0 }
  0xd3   :  { %v374_v62 = vpop.f32.mrf.mxu1  ;;  %286 = vst.msk [vmem:[%s646_s2 + $0x38] sm:$0xff] %vm278_vm1, %v358_v61 }
  0xd4   :  { %302 = vst.msk [vmem:[%s646_s2 + $0xb8] sm:$0xff] %vm278_vm1, %v374_v62  ;;  %v170_v63 = vpop.f32.mrf.mxu0 }
  0xd5   :  { %v234_v0 = vpop.f32.mrf.mxu1  ;;  %284 = vst.msk [vmem:[%s646_s2 + $0x28] sm:$0xff] %vm278_vm1, %v170_v63 }
  0xd6   :  { %300 = vst.msk [vmem:[%s646_s2 + $0xa8] sm:$0xff] %vm278_vm1, %v234_v0  ;;  %v361_v1 = vpop.f32.mrf.mxu0 }
  0xd7   :  { %v377_v2 = vpop.f32.mrf.mxu1  ;;  %289 = vst.msk [vmem:[%s646_s2 + $0x50] sm:$0xff] %vm278_vm1, %v361_v1 }
  0xd8   :  { %305 = vst.msk [vmem:[%s646_s2 + $0xd0] sm:$0xff] %vm278_vm1, %v377_v2  ;;  %v183_v3 = vpop.f32.mrf.mxu0 }
  0xd9   :  { %v247_v4 = vpop.f32.mrf.mxu1  ;;  %287 = vst.msk [vmem:[%s646_s2 + $0x40] sm:$0xff] %vm278_vm1, %v183_v3 }
  0xda   :  { %303 = vst.msk [vmem:[%s646_s2 + $0xc0] sm:$0xff] %vm278_vm1, %v247_v4  ;;  %v362_v5 = vpop.f32.mrf.mxu0 }
  0xdb   :  { %v378_v6 = vpop.f32.mrf.mxu1  ;;  %290 = vst.msk [vmem:[%s646_s2 + $0x58] sm:$0xff] %vm278_vm1, %v362_v5 }
  0xdc   :  { %306 = vst.msk [vmem:[%s646_s2 + $0xd8] sm:$0xff] %vm278_vm1, %v378_v6  ;;  %v186_v7 = vpop.f32.mrf.mxu0 }
  0xdd   :  { %v250_v8 = vpop.f32.mrf.mxu1  ;;  %288 = vst.msk [vmem:[%s646_s2 + $0x48] sm:$0xff] %vm278_vm1, %v186_v7 }
  0xde   :  { %304 = vst.msk [vmem:[%s646_s2 + $0xc8] sm:$0xff] %vm278_vm1, %v250_v8  ;;  %v365_v9 = vpop.f32.mrf.mxu0 }
  0xdf   :  { %v381_v10 = vpop.f32.mrf.mxu1  ;;  %293 = vst.msk [vmem:[%s646_s2 + $0x70] sm:$0xff] %vm278_vm1, %v365_v9 }
  0xe0   :  { %309 = vst.msk [vmem:[%s646_s2 + $0xf0] sm:$0xff] %vm278_vm1, %v381_v10  ;;  %v199_v11 = vpop.f32.mrf.mxu0 }
  0xe1   :  { %v263_v12 = vpop.f32.mrf.mxu1  ;;  %291 = vst.msk [vmem:[%s646_s2 + $0x60] sm:$0xff] %vm278_vm1, %v199_v11 }
  0xe2   :  { %307 = vst.msk [vmem:[%s646_s2 + $0xe0] sm:$0xff] %vm278_vm1, %v263_v12  ;;  %v366_v13 = vpop.f32.mrf.mxu0 }
  0xe3   :  { %v382_v14 = vpop.f32.mrf.mxu1  ;;  %294 = vst.msk [vmem:[%s646_s2 + $0x78] sm:$0xff] %vm278_vm1, %v366_v13 }
  0xe4   :  { %310 = vst.msk [vmem:[%s646_s2 + $0xf8] sm:$0xff] %vm278_vm1, %v382_v14  ;;  %v202_v15 = vpop.f32.mrf.mxu0 }
  0xe5   :  { %v266_v16 = vpop.f32.mrf.mxu1  ;;  %292 = vst.msk [vmem:[%s646_s2 + $0x68] sm:$0xff] %vm278_vm1, %v202_v15 }
  0xe6   :  { %308 = vst.msk [vmem:[%s646_s2 + $0xe8] sm:$0xff] %vm278_vm1, %v266_v16 }

</bundles_post_ra>
